<compile_context>
chip_gen: v7x
topology: tpu7x:2x2x1
jax: 0.10.0
libtpu: 0.0.40
codegen_flags: <defaults>
</compile_context>

<pallas_src>
import jax
import jax.numpy as jnp
from jax.experimental import pallas as pl
from jax.experimental.pallas import tpu as pltpu


def _round_up(x, m):
    return ((x + m - 1) // m) * m


def qnet_kernel(x_ref, w1_ref, b1_ref, w2_ref, w3_ref, out_ref):
    cdt = w1_ref.dtype  # compute dtype for MXU operands (bf16 or f32)
    x = x_ref[...].astype(cdt)
    # fc1: bias (and the constant-1 lane at column H1p-1) added on the VPU.
    h1 = jnp.dot(x, w1_ref[...], preferred_element_type=jnp.float32)
    h1 = jnp.maximum(h1 + b1_ref[...], 0.0).astype(cdt)
    # fc2: bias folded into W2a, picked up from the constant-1 lane (MXU).
    h2 = jnp.dot(h1, w2_ref[...], preferred_element_type=jnp.float32)
    h2 = jnp.maximum(h2, 0.0).astype(cdt)
    # fc3: bias folded into W3a via the 1-lane; no activation, no output padding.
    out = jnp.dot(h2, w3_ref[...], preferred_element_type=jnp.float32)
    out_ref[...] = out.astype(out_ref.dtype)


def prepare_qnetwork_params(params, compute_dtype=jnp.bfloat16):
    """One-time fold of fc2/fc3 biases into lane-padded weights (call at init).

    Returns (w1p, b1p, w2a, w3a):
      w1p : [S,   H1p]  fc1 weight, lane-padded
      b1p : [1,   H1p]  fc1 bias (f32), with b1p[0, H1p-1] == 1.0 (seeds 1-lane)
      w2a : [H1p, H2p]  fc2 weight with bias row at H1p-1; 1-lane kept alive
      w3a : [H2p, A  ]  fc3 weight with bias row at H2p-1
    so that relu(relu(x @ w1p + b1p) @ w2a) @ w3a == reference MLP output.
    """
    w1, b1 = params["w1"], params["b1"].reshape(-1)
    w2, b2 = params["w2"], params["b2"].reshape(-1)
    w3, b3 = params["w3"], params["b3"].reshape(-1)
    S, H1 = w1.shape
    H2, A = w3.shape
    H1p = _round_up(H1 + 1, 128)   # room for the constant-1 bias lane
    H2p = _round_up(H2 + 1, 128)

    w1p = jnp.zeros((S, H1p), jnp.float32).at[:, :H1].set(w1)

    b1p = jnp.zeros((1, H1p), jnp.float32).at[0, :H1].set(b1)
    b1p = b1p.at[0, H1p - 1].set(1.0)          # constant-1 lane after the ReLU

    w2a = jnp.zeros((H1p, H2p), jnp.float32).at[:H1, :H2].set(w2)
    w2a = w2a.at[H1p - 1, :H2].set(b2)         # fc2 bias via the 1-lane
    w2a = w2a.at[H1p - 1, H2p - 1].set(1.0)    # keep the 1-lane alive for fc3

    w3a = jnp.zeros((H2p, A), jnp.float32).at[:H2, :A].set(w3)
    w3a = w3a.at[H2p - 1, :A].set(b3)          # fc3 bias via the 1-lane

    return (w1p.astype(compute_dtype), b1p,
            w2a.astype(compute_dtype), w3a.astype(compute_dtype))


def qnetwork_forward(x, prepared, *, tile_b=512):
    """x: [B, state_size]. prepared: output of prepare_qnetwork_params()."""
    w1p, b1p, w2a, w3a = prepared
    B, S = x.shape
    Sw, H1p = w1p.shape
    H2p, A = w3a.shape
    assert Sw == S, (Sw, S)

    # Batch tile: always a multiple of 8 sublanes (legal BlockSpec), small
    # batches collapse to a single grid step, big batches keep >=2 steps with
    # the default tile_b so v7x can shard the "parallel" axis across both TCs.
    TB = _round_up(min(tile_b, B), 8)
    assert TB % 8 == 0
    Bp = _round_up(B, TB)
    if Bp != B:
        x = jnp.pad(x, ((0, Bp - B), (0, 0)))
    grid = (Bp // TB,)

    w_item = jnp.dtype(w1p.dtype).itemsize
    cost = pl.CostEstimate(
        flops=2 * Bp * (S * H1p + H1p * H2p + H2p * A),
        transcendentals=0,
        bytes_accessed=(Bp * S * x.dtype.itemsize
                        + (S * H1p + H1p * H2p + H2p * A) * w_item
                        + H1p * 4              # b1p
                        + Bp * A * 4),         # un-padded f32 output
    )

    out = pl.pallas_call(
        qnet_kernel,
        out_shape=jax.ShapeDtypeStruct((Bp, A), jnp.float32),
        grid=grid,
        in_specs=[
            pl.BlockSpec((TB, S), lambda i: (i, 0)),      # x streams over grid
            pl.BlockSpec((S, H1p), lambda i: (0, 0)),     # weights VMEM-resident
            pl.BlockSpec((1, H1p), lambda i: (0, 0)),
            pl.BlockSpec((H1p, H2p), lambda i: (0, 0)),
            pl.BlockSpec((H2p, A), lambda i: (0, 0)),
        ],
        out_specs=pl.BlockSpec((TB, A), lambda i: (i, 0)),
        compiler_params=pltpu.CompilerParams(
            dimension_semantics=("parallel",)),           # batch axis over TCs
        cost_estimate=cost,
    )(x, w1p, b1p, w2a, w3a)

    return out[:B]


def init_qnetwork_params(key, state_size, action_size, fc1_unit=64, fc2_unit=64):
    """Deterministic init mimicking nn.Linear's default U(-1/sqrt(fan_in), ...)."""
    def linear(key, fan_in, fan_out):
        kw, kb = jax.random.split(key)
        bound = 1.0 / jnp.sqrt(fan_in)
        w = jax.random.uniform(kw, (fan_in, fan_out), jnp.float32, -bound, bound)
        b = jax.random.uniform(kb, (1, fan_out), jnp.float32, -bound, bound)
        return w, b

    k1, k2, k3 = jax.random.split(key, 3)
    w1, b1 = linear(k1, state_size, fc1_unit)
    w2, b2 = linear(k2, fc1_unit, fc2_unit)
    w3, b3 = linear(k3, fc2_unit, action_size)
    return {"w1": w1, "b1": b1, "w2": w2, "b2": b2, "w3": w3, "b3": b3}


def qnetwork_forward_ref(x, params):
    """Pure-JAX reference of the PyTorch forward for correctness checking."""
    h1 = jnp.maximum(x @ params["w1"] + params["b1"], 0.0)
    h2 = jnp.maximum(h1 @ params["w2"] + params["b2"], 0.0)
    return h2 @ params["w3"] + params["b3"]


if __name__ == "__main__":
    key = jax.random.PRNGKey(0)
    k_params, k_x, k_x2 = jax.random.split(key, 3)

    state_size = 8
    action_size = 4
    params = init_qnetwork_params(k_params, state_size, action_size,
                                  fc1_unit=64, fc2_unit=64)

    # Augmented params are built ONCE (hoisted out of the forward path).
    prepared_f32 = prepare_qnetwork_params(params, compute_dtype=jnp.float32)
    prepared_bf16 = prepare_qnetwork_params(params)   # default bf16 operands

    # 1) Tiny inference batch, f32 compute (single grid step), tight tolerance.
    batch = 8
    x = jax.random.normal(k_x, (batch, state_size), jnp.float32)
    out = jax.block_until_ready(qnetwork_forward(x, prepared_f32))
    ref = qnetwork_forward_ref(x, params)
    assert out.shape == (batch, action_size), out.shape
    assert jnp.allclose(out, ref, atol=1e-5, rtol=1e-5), "f32 mismatch vs reference"

    # 2) Larger, non-tile-aligned batch with default bf16 operands (exercises
    #    grid streaming, resident weights, parallel batch axis, batch padding).
    big_batch = 300
    x_big = jax.random.normal(k_x2, (big_batch, state_size), jnp.float32)
    out_big = jax.block_until_ready(
        qnetwork_forward(x_big, prepared_bf16, tile_b=128))
    ref_big = qnetwork_forward_ref(x_big, params)
    assert out_big.shape == (big_batch, action_size), out_big.shape
    assert jnp.allclose(out_big, ref_big, atol=5e-2, rtol=5e-2), \
        "bf16 mismatch vs reference"

    print("KERNEL_OK")
</pallas_src>

<mosaic_0001>
module attributes {stable_mosaic.version = 11 : i64} {
  func.func @qnet_kernel(%arg0: i32, %arg1: memref<8x8xf32, #tpu.memory_space<vmem>>, %arg2: memref<8x128xf32, #tpu.memory_space<vmem>>, %arg3: memref<1x128xf32, #tpu.memory_space<vmem>>, %arg4: memref<128x128xf32, #tpu.memory_space<vmem>>, %arg5: memref<128x4xf32, #tpu.memory_space<vmem>>, %arg6: memref<8x4xf32, #tpu.memory_space<vmem>>) attributes {dimension_semantics = [#tpu.dimension_semantics<parallel>], iteration_bounds = array<i64: 1>, scalar_prefetch = 0 : i64, scratch_operands = 0 : i64, tpu.core_type = #tpu.core_type<tc>, window_params = [{transform_indices = @transform_0, window_bounds = array<i64: 8, 8>}, {pipeline_mode = #tpu.pipeline_mode<synchronous>, transform_indices = @transform_1, window_bounds = array<i64: 8, 128>}, {pipeline_mode = #tpu.pipeline_mode<synchronous>, transform_indices = @transform_2, window_bounds = array<i64: 1, 128>}, {pipeline_mode = #tpu.pipeline_mode<synchronous>, transform_indices = @transform_3, window_bounds = array<i64: 128, 128>}, {pipeline_mode = #tpu.pipeline_mode<synchronous>, transform_indices = @transform_4, window_bounds = array<i64: 128, 4>}, {transform_indices = @transform_5, window_bounds = array<i64: 8, 4>}]} {
    %c0 = arith.constant 0 : index
    %c0_0 = arith.constant 0 : index
    %0 = vector.load %arg1[%c0, %c0_0] : memref<8x8xf32, #tpu.memory_space<vmem>>, vector<8x8xf32>
    %c0_1 = arith.constant 0 : index
    %c0_2 = arith.constant 0 : index
    %1 = vector.load %arg2[%c0_1, %c0_2] : memref<8x128xf32, #tpu.memory_space<vmem>>, vector<8x128xf32>
    %cst = arith.constant dense<0.000000e+00> : vector<8x128xf32>
    %2 = tpu.matmul %0, %1, %cst {dimension_numbers = #tpu.dot_dimension_numbers<[1], [0], [0], [1], [0, 0, 1, 1], [], []>} : vector<8x8xf32>, vector<8x128xf32>, vector<8x128xf32> -> vector<8x128xf32>
    %c0_3 = arith.constant 0 : index
    %c0_4 = arith.constant 0 : index
    %3 = vector.load %arg3[%c0_3, %c0_4] : memref<1x128xf32, #tpu.memory_space<vmem>>, vector<1x128xf32>
    %4 = vector.broadcast %3 : vector<1x128xf32> to vector<8x128xf32>
    %5 = arith.addf %2, %4 : vector<8x128xf32>
    %cst_5 = arith.constant 0.000000e+00 : f32
    %6 = vector.broadcast %cst_5 : f32 to vector<8x128xf32>
    %7 = arith.maximumf %5, %6 : vector<8x128xf32>
    %c0_6 = arith.constant 0 : index
    %c0_7 = arith.constant 0 : index
    %8 = vector.load %arg4[%c0_6, %c0_7] : memref<128x128xf32, #tpu.memory_space<vmem>>, vector<128x128xf32>
    %cst_8 = arith.constant dense<0.000000e+00> : vector<8x128xf32>
    %9 = tpu.matmul %7, %8, %cst_8 {dimension_numbers = #tpu.dot_dimension_numbers<[1], [0], [0], [1], [0, 0, 1, 1], [], []>} : vector<8x128xf32>, vector<128x128xf32>, vector<8x128xf32> -> vector<8x128xf32>
    %cst_9 = arith.constant 0.000000e+00 : f32
    %10 = vector.broadcast %cst_9 : f32 to vector<8x128xf32>
    %11 = arith.maximumf %9, %10 : vector<8x128xf32>
    %c0_10 = arith.constant 0 : index
    %c0_11 = arith.constant 0 : index
    %12 = vector.load %arg5[%c0_10, %c0_11] : memref<128x4xf32, #tpu.memory_space<vmem>>, vector<128x4xf32>
    %cst_12 = arith.constant dense<0.000000e+00> : vector<8x4xf32>
    %13 = tpu.matmul %11, %12, %cst_12 {dimension_numbers = #tpu.dot_dimension_numbers<[1], [0], [0], [1], [0, 0, 1, 1], [], []>} : vector<8x128xf32>, vector<128x4xf32>, vector<8x4xf32> -> vector<8x4xf32>
    %c0_13 = arith.constant 0 : index
    %c0_14 = arith.constant 0 : index
    %14 = vector.load %arg6[%c0_13, %c0_14] : memref<8x4xf32, #tpu.memory_space<vmem>>, vector<8x4xf32>
    tpu.vector_store %arg6[%c0_13, %c0_14], %13 {strides = array<i32>} : memref<8x4xf32, #tpu.memory_space<vmem>>, vector<8x4xf32>,
    return
  }
  func.func @transform_0(%arg0: i32) -> (i32, i32) {
    %c0_i32 = arith.constant 0 : i32
    %c0_i32_0 = arith.constant 0 : i32
    return %arg0, %c0_i32 : i32, i32
  }
  func.func @transform_1(%arg0: i32) -> (i32, i32) {
    %c0_i32 = arith.constant 0 : i32
    %c0_i32_0 = arith.constant 0 : i32
    %c0_i32_1 = arith.constant 0 : i32
    return %c0_i32, %c0_i32_0 : i32, i32
  }
  func.func @transform_2(%arg0: i32) -> (i32, i32) {
    %c0_i32 = arith.constant 0 : i32
    %c0_i32_0 = arith.constant 0 : i32
    %c0_i32_1 = arith.constant 0 : i32
    return %c0_i32, %c0_i32_0 : i32, i32
  }
  func.func @transform_3(%arg0: i32) -> (i32, i32) {
    %c0_i32 = arith.constant 0 : i32
    %c0_i32_0 = arith.constant 0 : i32
    %c0_i32_1 = arith.constant 0 : i32
    return %c0_i32, %c0_i32_0 : i32, i32
  }
  func.func @transform_4(%arg0: i32) -> (i32, i32) {
    %c0_i32 = arith.constant 0 : i32
    %c0_i32_0 = arith.constant 0 : i32
    %c0_i32_1 = arith.constant 0 : i32
    return %c0_i32, %c0_i32_0 : i32, i32
  }
  func.func @transform_5(%arg0: i32) -> (i32, i32) {
    %c0_i32 = arith.constant 0 : i32
    %c0_i32_0 = arith.constant 0 : i32
    return %arg0, %c0_i32 : i32, i32
  }
}

</mosaic_0001>

<bundles_post_ra>
// kernel: tpu_custom_call.1
= control target key start
LH: loop header
LB: loop body
LE: loop exit
PB: predicated region body
PF: predicated region fallthrough
CT: control target
= control target key end

     0   :  { %10 = vsyncpa [#allocation3], 0  ;;  %s485_s18 = smov [#allocation2]   ;;  %s655_s0 = inlined_call_operand.vmem [shape: f32[8,8], index: 0, kind: input, shape index: {}]   ;;  %s656_s1 = inlined_call_operand.hbm [shape: f32[8,128], index: 1, kind: input, shape index: {}]   ;;  %s657_s2 = inlined_call_operand.vmem [shape: f32[1,128], index: 2, kind: input, shape index: {}]   ;;  %s658_s3 = inlined_call_operand.vmem [shape: f32[128,128], index: 3, kind: input, shape index: {}]   ;;  %s659_s4 = inlined_call_operand.vmem [shape: f32[128,4], index: 4, kind: input, shape index: {}]   ;;  %s660_s5 = inlined_call_operand.vmem [shape: f32[8,4], index: 5, kind: output, shape index: {}]  }
   0x1   :  { %s19_s19 = sshll.u32 %s485_s18, 4  ;;  %s461_s22 = scalar_lea.hbm %s656_s1, 128  ;;  %s20_s19 = int_to_ptr.vmem [resolvable:$true] %s19_s19 }
   0x2   :  { %p462_p0 = scmp.ne.s32.totalorder %s656_s1, %s461_s22  ;;  %p465_p1 = scmp.lt.u32.totalorder %s461_s22, %s656_s1 }
   0x4   :  { %p467_p2 = pnand %p465_p1, %p462_p0 }
   0x6   :  { %470 = shalt.err (!%p467_p2)
}
   0x7   :  { %s471_s27 = scalar_lea.vmem %s20_s19, 128  ;;  %p476_p4 = scmp.lt.s32.totalorder %s20_s19, %s20_s19 }
   0x8   :  { %p472_p3 = scmp.ne.s32.totalorder %s20_s19, %s471_s27  ;;  %p477_p5 = scmp.lt.s32.totalorder %s471_s27, %s471_s27 }
   0xa   :  { %p478_p6 = por %p477_p5, %p476_p4 }
   0xc   :  { %p479_p7 = pnand %p478_p6, %p472_p3 }
   0xe   :  { %482 = shalt.err (!%p479_p7)
}
   0xf   :  { %22 = dma.hbm_to_vmem [thread:$0]  %s656_s1, 128, %s20_s19, [#allocation3]  }
  0x10   :  { %483 = dma.done.wait [#allocation3], 128  }
  0x11   :  { %484 = vsyncadd [#allocation3], 4294967168  ;;  %v486_v0 = vmov 0.0   ;;  %vm487_vm0 = vmmov 0   ;;  %v488_v1 = vmov 0.0|0.0   ;;  %vm41_vm1 = vcmask 64512  }
  0x12   :  { %334 = vmatprep.subr.mxu0 %v486_v0  ;;  %336 = vmatprep.mubr.msk.f32.mxu0 %vm487_vm0, %v486_v0  ;;  %v33_v2 = vld [vmem:[#allocation2] sm:$0xff]  ;;  %v117_v5 = vld [vmem:[%s658_s3 + $0x8] sm:$0xff]  ;;  %v118_v6 = vld [vmem:[%s658_s3 + $0x10] sm:$0xff]  ;;  %vm289_vm2 = vcmask 31744  }
  0x13   :  { %409 = vmatprep.subr.bf16.mxu1 %v488_v1  ;;  %371 = vmatprep.mubr.msk.f32.mxu1 %vm487_vm0, %v486_v0  ;;  %v32_v3 = vld [vmem:[%s655_s0] sm:$0xff]  ;;  %v119_v7 = vld [vmem:[%s658_s3 + $0x18] sm:$0xff]  ;;  %v121_v11 = vld [vmem:[%s658_s3 + $0x28] sm:$0xff] }
  0x14   :  { %v116_v4 = vld [vmem:[%s658_s3] sm:$0xff]  ;;  %335 = vmatpush3.msra.mxu0 %v33_v2  ;;  %v413_v9 = vpack.c.bf16 %v119_v7, %v118_v6  ;;  %v122_v13 = vld [vmem:[%s658_s3 + $0x30] sm:$0xff]  ;;  %v123_v14 = vld [vmem:[%s658_s3 + $0x38] sm:$0xff] }
  0x15   :  { %337 = vmatmul.mubr.msk.f32.vlgmr.msra.gmra.mrb[0].mxu0 %vm41_vm1, %v32_v3  ;;  %v410_v8 = vpack.c.bf16 %v117_v5, %v116_v4  ;;  %433 = vmatprep.subr.bf16.mxu0 %v488_v1  ;;  %v120_v10 = vld [vmem:[%s658_s3 + $0x20] sm:$0xff]  ;;  %v419_v15 = vpack.c.bf16 %v123_v14, %v122_v13  ;;  %v125_v17 = vld [vmem:[%s658_s3 + $0x48] sm:$0xff]  ;;  %v126_v19 = vld [vmem:[%s658_s3 + $0x50] sm:$0xff] }
  0x16   :  { %406 = vmatprep.mubr.msk.f32.mxu0 %vm487_vm0, %v486_v0  ;;  %v416_v12 = vpack.c.bf16 %v121_v11, %v120_v10  ;;  %v124_v16 = vld [vmem:[%s658_s3 + $0x40] sm:$0xff]  ;;  %v127_v20 = vld [vmem:[%s658_s3 + $0x58] sm:$0xff]  ;;  %v129_v23 = vld [vmem:[%s658_s3 + $0x68] sm:$0xff] }
  0x17   :  { %411 = vmatpush3.bf16.msra.mxu1 %v410_v8  ;;  %v422_v18 = vpack.c.bf16 %v125_v17, %v124_v16  ;;  %v425_v21 = vpack.c.bf16 %v127_v20, %v126_v19  ;;  %v128_v22 = vld [vmem:[%s658_s3 + $0x60] sm:$0xff]  ;;  %v130_v25 = vld [vmem:[%s658_s3 + $0x70] sm:$0xff]  ;;  %v131_v26 = vld [vmem:[%s658_s3 + $0x78] sm:$0xff] }
  0x18   :  { %412 = vmatprep.subr.bf16.mxu1 %v488_v1  ;;  %v428_v24 = vpack.c.bf16 %v129_v23, %v128_v22  ;;  %v431_v27 = vpack.c.bf16 %v131_v26, %v130_v25  ;;  %v203_v28 = vld [vmem:[%s659_s4] sm:$0xff]  ;;  %v204_v29 = vld [vmem:[%s659_s4 + $0x8] sm:$0xff]  ;;  %v205_v30 = vld [vmem:[%s659_s4 + $0x10] sm:$0xff] }
  0x19   :  { %v434_v31 = vpack.c.bf16 %v204_v29, %v203_v28  ;;  %v206_v32 = vld [vmem:[%s659_s4 + $0x18] sm:$0xff]  ;;  %v207_v34 = vld [vmem:[%s659_s4 + $0x20] sm:$0xff]  ;;  %v208_v35 = vld [vmem:[%s659_s4 + $0x28] sm:$0xff] }
  0x1a   :  { %v437_v33 = vpack.c.bf16 %v206_v32, %v205_v30  ;;  %v440_v36 = vpack.c.bf16 %v208_v35, %v207_v34  ;;  %v209_v37 = vld [vmem:[%s659_s4 + $0x30] sm:$0xff]  ;;  %v210_v38 = vld [vmem:[%s659_s4 + $0x38] sm:$0xff]  ;;  %v211_v40 = vld [vmem:[%s659_s4 + $0x40] sm:$0xff] }
  0x1b   :  { %414 = vmatpush3.bf16.msra.mxu1 %v413_v9  ;;  %435 = vmatpush3.bf16.msra.mxu0 %v434_v31  ;;  %v443_v39 = vpack.c.bf16 %v210_v38, %v209_v37  ;;  %v212_v41 = vld [vmem:[%s659_s4 + $0x48] sm:$0xff]  ;;  %v213_v43 = vld [vmem:[%s659_s4 + $0x50] sm:$0xff]  ;;  %v214_v44 = vld [vmem:[%s659_s4 + $0x58] sm:$0xff] }
  0x1c   :  { %415 = vmatprep.subr.bf16.mxu1 %v488_v1  ;;  %436 = vmatprep.subr.bf16.mxu0 %v488_v1  ;;  %v446_v42 = vpack.c.bf16 %v212_v41, %v211_v40  ;;  %v449_v45 = vpack.c.bf16 %v214_v44, %v213_v43  ;;  %v215_v46 = vld [vmem:[%s659_s4 + $0x60] sm:$0xff]  ;;  %v216_v47 = vld [vmem:[%s659_s4 + $0x68] sm:$0xff]  ;;  %v217_v54 = vld [vmem:[%s659_s4 + $0x70] sm:$0xff] }
  0x1d   :  { %v452_v48 = vpack.c.bf16 %v216_v47, %v215_v46  ;;  %v296_v49 = vld [vmem:[%s657_s2] ss:$0 sm:$0xff]  ;;  %v218_v55 = vld [vmem:[%s659_s4 + $0x78] sm:$0xff] }
  0x1e   :  { %v455_v56 = vpack.c.bf16 %v218_v55, %v217_v54 }
  0x1f   :  { %417 = vmatpush3.bf16.msra.mxu1 %v416_v12  ;;  %438 = vmatpush3.bf16.msra.mxu0 %v437_v33 }
  0x20   :  { %418 = vmatprep.subr.bf16.mxu1 %v488_v1  ;;  %439 = vmatprep.subr.bf16.mxu0 %v488_v1 }
  0x23   :  { %420 = vmatpush3.bf16.msra.mxu1 %v419_v15  ;;  %441 = vmatpush3.bf16.msra.mxu0 %v440_v36 }
  0x24   :  { %421 = vmatprep.subr.bf16.mxu1 %v488_v1  ;;  %442 = vmatprep.subr.bf16.mxu0 %v488_v1 }
  0x27   :  { %423 = vmatpush3.bf16.msra.mxu1 %v422_v18  ;;  %444 = vmatpush3.bf16.msra.mxu0 %v443_v39 }
  0x28   :  { %424 = vmatprep.subr.bf16.mxu1 %v488_v1  ;;  %445 = vmatprep.subr.bf16.mxu0 %v488_v1 }
  0x2b   :  { %426 = vmatpush3.bf16.msra.mxu1 %v425_v21  ;;  %447 = vmatpush3.bf16.msra.mxu0 %v446_v42 }
  0x2c   :  { %427 = vmatprep.subr.bf16.mxu1 %v488_v1  ;;  %448 = vmatprep.subr.bf16.mxu0 %v488_v1 }
  0x2f   :  { %429 = vmatpush3.bf16.msra.mxu1 %v428_v24  ;;  %450 = vmatpush3.bf16.msra.mxu0 %v449_v45 }
  0x30   :  { %430 = vmatprep.subr.bf16.mxu1 %v488_v1  ;;  %451 = vmatprep.subr.bf16.mxu0 %v488_v1 }
  0x33   :  { %432 = vmatpush3.bf16.msra.mxu1 %v431_v27  ;;  %453 = vmatpush3.bf16.msra.mxu0 %v452_v48 }
  0x34   :  { %454 = vmatprep.subr.bf16.mxu0 %v488_v1 }
  0x37   :  { %456 = vmatpush3.bf16.msra.mxu0 %v455_v56 }
  0xe8   :  { %v111_v50 = vpop.f32.mrb[0].mxu0 }
  0xe9   :  { %v112_v51 = vadd.f32 %v296_v49, %v111_v50  ;;  %v338_v52 = vpop.f32.mrb[1].mxu0 }
  0xeb   :  { %v115_v53 = vmax.f32 %v112_v51, 0.0 }
  0xed   :  { %372 = vmatmul.mubr.f32.vlgmr.msra.gmra.mrb[0].mxu1 %v115_v53 }
 0x1c0   :  { %v198_v57 = vpop.f32.mrb[0].mxu1 }
 0x1c1   :  { %v202_v58 = vmax.f32 %v198_v57, 0.0  ;;  %v373_v59 = vpop.f32.mrb[1].mxu1 }
 0x1c3   :  { %407 = vmatmul.mubr.f32.vlgmr.msra.gmra.mrb[2].mxu0 %v202_v58 }
 0x296   :  { %v285_v60 = vpop.f32.mrb[2].mxu0 }
 0x297   :  { %290 = vst.msk [vmem:[%s660_s5] sm:$0xff] %vm289_vm2, %v285_v60  ;;  %v408_v61 = vpop.f32.mrb[3].mxu0 }
 0x298   :  { %295 = vsyncpa [#allocation3], 1 }

</bundles_post_ra>
